<compile_context>
chip_gen: v7x
topology: tpu7x:2x2x1
jax: 0.10.0
libtpu: 0.0.40
codegen_flags: <defaults>
</compile_context>

<pallas_src>
import functools

import jax
import jax.numpy as jnp
from jax.experimental import pallas as pl
from jax.experimental.pallas import tpu as pltpu


def _round_up(x, m):
    return (x + m - 1) // m * m


def _mlp_kernel(*refs, n_layers, last_l1):
    """Fused MLP forward for one batch tile.

    refs = (x_ref, w0_ref, b0_ref, ..., w{L-1}_ref, b{L-1}_ref, o_ref)
    Hidden layers: Linear -> ReLU ; last layer: plain Linear (module default).
    Optional last_l1 divides logits by their per-row sum.
    """
    x_ref, o_ref = refs[0], refs[-1]
    wb = refs[1:-1]

    h = x_ref[...]                                  # (tb, f0_pad), compute dtype (bf16)
    for layer in range(n_layers):
        w = wb[2 * layer][...]                      # (f_in_pad, f_out_pad), compute dtype
        b = wb[2 * layer + 1][...]                  # (1, f_out_pad), float32
        # MXU matmul with f32 accumulation; bias add / activation stay in f32.
        h = jnp.dot(h, w, preferred_element_type=jnp.float32) + b
        if layer < n_layers - 1:
            h = jnp.maximum(h, 0.0).astype(w.dtype)  # ReLU, back to MXU dtype

    if last_l1:
        # NOTE: matches PyTorch semantics (raw row-sum can be ~0 / negative ->
        # numerically fragile); approx reciprocal runs on the EUP slot.
        h = h * pl.reciprocal(jnp.sum(h, axis=1, keepdims=True), approx=True)
    o_ref[...] = h.astype(o_ref.dtype)


def full_connect_forward(x, weights, biases, *, last_l1=False,
                         block_b=256, compute_dtype=jnp.bfloat16):
    """FullConnect forward as a single batch-tiled Pallas call.

    Args:
      x:        (B, n_features[0]) array (float32 typical)
      weights:  list of (n_features[i], n_features[i+1]) arrays (torch weight.T)
      biases:   list of (1, n_features[i+1]) arrays
      last_l1:  divide logits by their per-row sum (module's last_l1 flag)
      block_b:  batch-tile rows (rounded to a multiple of 8)
      compute_dtype: dtype fed to the MXU (bf16 recommended on all generations)
    """
    n_layers = len(weights)
    B, f_in = x.shape
    f_out = weights[-1].shape[1]
    out_dtype = x.dtype

    # --- padding: features -> multiples of 128 (lane dense), batch -> tile multiple.
    feats = [f_in] + [w.shape[1] for w in weights]
    feats_p = [_round_up(f, 128) for f in feats]

    tb = max(8, min(_round_up(block_b, 8), _round_up(B, 8)))
    B_pad = _round_up(B, tb)
    num_tiles = B_pad // tb

    x_p = jnp.zeros((B_pad, feats_p[0]), compute_dtype)
    x_p = x_p.at[:B, :f_in].set(x.astype(compute_dtype))

    operands = [x_p]
    in_specs = [pl.BlockSpec((tb, feats_p[0]), lambda i: (i, 0))]
    for li, (w, b) in enumerate(zip(weights, biases)):
        fi, fo = feats_p[li], feats_p[li + 1]
        wp = jnp.zeros((fi, fo), compute_dtype).at[:w.shape[0], :w.shape[1]].set(
            w.astype(compute_dtype))
        bp = jnp.zeros((1, fo), jnp.float32).at[:, :b.shape[-1]].set(
            b.reshape(1, -1).astype(jnp.float32))
        operands += [wp, bp]
        # constant index_map -> weights/biases resident in VMEM for all tiles.
        in_specs += [pl.BlockSpec((fi, fo), lambda i: (0, 0)),
                     pl.BlockSpec((1, fo), lambda i: (0, 0))]

    out_spec = pl.BlockSpec((tb, feats_p[-1]), lambda i: (i, 0))

    # VMEM budget (x/out double-buffered tiles + resident weights, x2 buffers).
    bpe_c = jnp.dtype(compute_dtype).itemsize
    vmem_est = (2 * tb * feats_p[0] * bpe_c
                + 2 * tb * feats_p[-1] * jnp.dtype(out_dtype).itemsize
                + sum(2 * fi * fo * bpe_c
                      for fi, fo in zip(feats_p[:-1], feats_p[1:]))
                + sum(2 * fo * 4 for fo in feats_p[1:]))
    cp_kwargs = dict(dimension_semantics=("parallel",))  # v7x: 2 TCs share the grid
    if vmem_est > (24 << 20):
        # TODO(synk): very large layers on v7x (64 MiB VMEM) would need K-tiling.
        cp_kwargs["vmem_limit_bytes"] = min(int(vmem_est * 1.5) + (4 << 20), 64 << 20)

    kernel = functools.partial(_mlp_kernel, n_layers=n_layers, last_l1=last_l1)
    out_p = pl.pallas_call(
        kernel,
        out_shape=jax.ShapeDtypeStruct((B_pad, feats_p[-1]), out_dtype),
        grid=(num_tiles,),
        in_specs=in_specs,
        out_specs=out_spec,
        compiler_params=pltpu.CompilerParams(**cp_kwargs),
    )(*operands)

    return out_p[:B, :f_out]


def init_params(key, n_features):
    """PyTorch-style nn.Linear init: U(-1/sqrt(fan_in), 1/sqrt(fan_in))."""
    weights, biases = [], []
    for i in range(len(n_features) - 1):
        fan_in, fan_out = n_features[i], n_features[i + 1]
        key, kw, kb = jax.random.split(key, 3)
        bound = 1.0 / (fan_in ** 0.5)
        # stored as (in, out) == torch weight.T
        w = jax.random.uniform(kw, (fan_in, fan_out), jnp.float32, -bound, bound)
        b = jax.random.uniform(kb, (1, fan_out), jnp.float32, -bound, bound)
        weights.append(w)
        biases.append(b)
    return weights, biases


def reference_forward(x, weights, biases, *, last_l1=False, compute_dtype=jnp.bfloat16):
    """Pure-JAX reference with the same bf16-matmul / f32-accumulate path."""
    h = x.astype(compute_dtype)
    for i, (w, b) in enumerate(zip(weights, biases)):
        h = jnp.dot(h, w.astype(compute_dtype),
                    preferred_element_type=jnp.float32) + b.astype(jnp.float32)
        if i < len(weights) - 1:
            h = jnp.maximum(h, 0.0).astype(compute_dtype)
    if last_l1:
        h = h / jnp.sum(h, axis=1, keepdims=True)
    return h.astype(x.dtype)


if __name__ == "__main__":
    # FullConnect(n_features=[32, 64, 64, 16]) with default args.
    n_features = [32, 64, 64, 16]
    batch = 64

    key = jax.random.PRNGKey(0)
    key, kx = jax.random.split(key)
    x = jax.random.normal(kx, (batch, n_features[0]), jnp.float32)
    weights, biases = init_params(key, n_features)

    # block_b=16 -> 4 batch tiles, exercising the pipelined/parallel grid.
    out = full_connect_forward(x, weights, biases, last_l1=False, block_b=16)
    out = jax.block_until_ready(out)

    ref = reference_forward(x, weights, biases, last_l1=False)
    assert out.shape == (batch, n_features[-1])
    assert jnp.allclose(out, ref, atol=5e-3, rtol=5e-3), "mismatch vs reference"

    print("KERNEL_OK")
</pallas_src>

<mosaic_0001>
module attributes {stable_mosaic.version = 11 : i64} {
  func.func @_mlp_kernel(%arg0: i32, %arg1: memref<16x128xbf16, #tpu.memory_space<vmem>>, %arg2: memref<128x128xbf16, #tpu.memory_space<vmem>>, %arg3: memref<1x128xf32, #tpu.memory_space<vmem>>, %arg4: memref<128x128xbf16, #tpu.memory_space<vmem>>, %arg5: memref<1x128xf32, #tpu.memory_space<vmem>>, %arg6: memref<128x128xbf16, #tpu.memory_space<vmem>>, %arg7: memref<1x128xf32, #tpu.memory_space<vmem>>, %arg8: memref<16x128xf32, #tpu.memory_space<vmem>>) attributes {dimension_semantics = [#tpu.dimension_semantics<parallel>], iteration_bounds = array<i64: 4>, scalar_prefetch = 0 : i64, scratch_operands = 0 : i64, tpu.core_type = #tpu.core_type<tc>, window_params = [{transform_indices = @transform_0, window_bounds = array<i64: 16, 128>}, {pipeline_mode = #tpu.pipeline_mode<synchronous>, transform_indices = @transform_1, window_bounds = array<i64: 128, 128>}, {pipeline_mode = #tpu.pipeline_mode<synchronous>, transform_indices = @transform_2, window_bounds = array<i64: 1, 128>}, {pipeline_mode = #tpu.pipeline_mode<synchronous>, transform_indices = @transform_3, window_bounds = array<i64: 128, 128>}, {pipeline_mode = #tpu.pipeline_mode<synchronous>, transform_indices = @transform_4, window_bounds = array<i64: 1, 128>}, {pipeline_mode = #tpu.pipeline_mode<synchronous>, transform_indices = @transform_5, window_bounds = array<i64: 128, 128>}, {pipeline_mode = #tpu.pipeline_mode<synchronous>, transform_indices = @transform_6, window_bounds = array<i64: 1, 128>}, {transform_indices = @transform_7, window_bounds = array<i64: 16, 128>}]} {
    %c0 = arith.constant 0 : index
    %c0_0 = arith.constant 0 : index
    %0 = vector.load %arg1[%c0, %c0_0] : memref<16x128xbf16, #tpu.memory_space<vmem>>, vector<16x128xbf16>
    %c0_1 = arith.constant 0 : index
    %c0_2 = arith.constant 0 : index
    %1 = vector.load %arg2[%c0_1, %c0_2] : memref<128x128xbf16, #tpu.memory_space<vmem>>, vector<128x128xbf16>
    %c0_3 = arith.constant 0 : index
    %c0_4 = arith.constant 0 : index
    %2 = vector.load %arg3[%c0_3, %c0_4] : memref<1x128xf32, #tpu.memory_space<vmem>>, vector<1x128xf32>
    %cst = arith.constant dense<0.000000e+00> : vector<16x128xf32>
    %3 = tpu.matmul %0, %1, %cst {dimension_numbers = #tpu.dot_dimension_numbers<[1], [0], [0], [1], [0, 0, 1, 1], [], []>} : vector<16x128xbf16>, vector<128x128xbf16>, vector<16x128xf32> -> vector<16x128xf32>
    %4 = vector.broadcast %2 : vector<1x128xf32> to vector<16x128xf32>
    %5 = arith.addf %3, %4 : vector<16x128xf32>
    %cst_5 = arith.constant 0.000000e+00 : f32
    %6 = vector.broadcast %cst_5 : f32 to vector<16x128xf32>
    %7 = arith.maximumf %5, %6 : vector<16x128xf32>
    %8 = arith.truncf %7 : vector<16x128xf32> to vector<16x128xbf16>
    %c0_6 = arith.constant 0 : index
    %c0_7 = arith.constant 0 : index
    %9 = vector.load %arg4[%c0_6, %c0_7] : memref<128x128xbf16, #tpu.memory_space<vmem>>, vector<128x128xbf16>
    %c0_8 = arith.constant 0 : index
    %c0_9 = arith.constant 0 : index
    %10 = vector.load %arg5[%c0_8, %c0_9] : memref<1x128xf32, #tpu.memory_space<vmem>>, vector<1x128xf32>
    %cst_10 = arith.constant dense<0.000000e+00> : vector<16x128xf32>
    %11 = tpu.matmul %8, %9, %cst_10 {dimension_numbers = #tpu.dot_dimension_numbers<[1], [0], [0], [1], [0, 0, 1, 1], [], []>} : vector<16x128xbf16>, vector<128x128xbf16>, vector<16x128xf32> -> vector<16x128xf32>
    %12 = vector.broadcast %10 : vector<1x128xf32> to vector<16x128xf32>
    %13 = arith.addf %11, %12 : vector<16x128xf32>
    %cst_11 = arith.constant 0.000000e+00 : f32
    %14 = vector.broadcast %cst_11 : f32 to vector<16x128xf32>
    %15 = arith.maximumf %13, %14 : vector<16x128xf32>
    %16 = arith.truncf %15 : vector<16x128xf32> to vector<16x128xbf16>
    %c0_12 = arith.constant 0 : index
    %c0_13 = arith.constant 0 : index
    %17 = vector.load %arg6[%c0_12, %c0_13] : memref<128x128xbf16, #tpu.memory_space<vmem>>, vector<128x128xbf16>
    %c0_14 = arith.constant 0 : index
    %c0_15 = arith.constant 0 : index
    %18 = vector.load %arg7[%c0_14, %c0_15] : memref<1x128xf32, #tpu.memory_space<vmem>>, vector<1x128xf32>
    %cst_16 = arith.constant dense<0.000000e+00> : vector<16x128xf32>
    %19 = tpu.matmul %16, %17, %cst_16 {dimension_numbers = #tpu.dot_dimension_numbers<[1], [0], [0], [1], [0, 0, 1, 1], [], []>} : vector<16x128xbf16>, vector<128x128xbf16>, vector<16x128xf32> -> vector<16x128xf32>
    %20 = vector.broadcast %18 : vector<1x128xf32> to vector<16x128xf32>
    %21 = arith.addf %19, %20 : vector<16x128xf32>
    %c0_17 = arith.constant 0 : index
    %c0_18 = arith.constant 0 : index
    %22 = vector.load %arg8[%c0_17, %c0_18] : memref<16x128xf32, #tpu.memory_space<vmem>>, vector<16x128xf32>
    tpu.vector_store %arg8[%c0_17, %c0_18], %21 {strides = array<i32>} : memref<16x128xf32, #tpu.memory_space<vmem>>, vector<16x128xf32>,
    return
  }
  func.func @transform_0(%arg0: i32) -> (i32, i32) {
    %c0_i32 = arith.constant 0 : i32
    %c0_i32_0 = arith.constant 0 : i32
    return %arg0, %c0_i32 : i32, i32
  }
  func.func @transform_1(%arg0: i32) -> (i32, i32) {
    %c0_i32 = arith.constant 0 : i32
    %c0_i32_0 = arith.constant 0 : i32
    %c0_i32_1 = arith.constant 0 : i32
    return %c0_i32, %c0_i32_0 : i32, i32
  }
  func.func @transform_2(%arg0: i32) -> (i32, i32) {
    %c0_i32 = arith.constant 0 : i32
    %c0_i32_0 = arith.constant 0 : i32
    %c0_i32_1 = arith.constant 0 : i32
    return %c0_i32, %c0_i32_0 : i32, i32
  }
  func.func @transform_3(%arg0: i32) -> (i32, i32) {
    %c0_i32 = arith.constant 0 : i32
    %c0_i32_0 = arith.constant 0 : i32
    %c0_i32_1 = arith.constant 0 : i32
    return %c0_i32, %c0_i32_0 : i32, i32
  }
  func.func @transform_4(%arg0: i32) -> (i32, i32) {
    %c0_i32 = arith.constant 0 : i32
    %c0_i32_0 = arith.constant 0 : i32
    %c0_i32_1 = arith.constant 0 : i32
    return %c0_i32, %c0_i32_0 : i32, i32
  }
  func.func @transform_5(%arg0: i32) -> (i32, i32) {
    %c0_i32 = arith.constant 0 : i32
    %c0_i32_0 = arith.constant 0 : i32
    %c0_i32_1 = arith.constant 0 : i32
    return %c0_i32, %c0_i32_0 : i32, i32
  }
  func.func @transform_6(%arg0: i32) -> (i32, i32) {
    %c0_i32 = arith.constant 0 : i32
    %c0_i32_0 = arith.constant 0 : i32
    %c0_i32_1 = arith.constant 0 : i32
    return %c0_i32, %c0_i32_0 : i32, i32
  }
  func.func @transform_7(%arg0: i32) -> (i32, i32) {
    %c0_i32 = arith.constant 0 : i32
    %c0_i32_0 = arith.constant 0 : i32
    return %arg0, %c0_i32 : i32, i32
  }
}

</mosaic_0001>

<bundles_post_ra>
// kernel: tpu_custom_call.1
= control target key start
LH: loop header
LB: loop body
LE: loop exit
PB: predicated region body
PF: predicated region fallthrough
CT: control target
= control target key end

     0   :  { %12 = vsyncpa [#allocation3], 0  ;;  %s1610_s0 = inlined_call_operand.hbm [shape: bf16[64,128], index: 0, kind: input, shape index: {}]   ;;  %s1611_s1 = inlined_call_operand.hbm [shape: bf16[128,128], index: 1, kind: input, shape index: {}]   ;;  %s1612_s2 = inlined_call_operand.vmem [shape: f32[1,128], index: 2, kind: input, shape index: {}]   ;;  %s1613_s3 = inlined_call_operand.hbm [shape: bf16[128,128], index: 3, kind: input, shape index: {}]   ;;  %s1614_s4 = inlined_call_operand.vmem [shape: f32[1,128], index: 4, kind: input, shape index: {}]   ;;  %s1615_s5 = inlined_call_operand.hbm [shape: bf16[128,128], index: 5, kind: input, shape index: {}]   ;;  %s1616_s6 = inlined_call_operand.vmem [shape: f32[1,128], index: 6, kind: input, shape index: {}]   ;;  %s1617_s7 = inlined_call_operand.hbm [shape: f32[64,128], index: 7, kind: output, shape index: {}]  }
   0x1   :  { %14 = vsyncpa [#allocation3 + $0x1], 0 }
   0x2   :  { %15 = vsyncpa [#allocation6], 0 }
   0x3   :  { %16 = vsyncpa [#allocation9], 0 }
   0x4   :  { %17 = vsyncpa [#allocation4], 0 }
   0x5   :  { %19 = vsyncpa [#allocation4 + $0x1], 0  ;;  %s1298_s24 = smov 0   ;;  %s1300_s25 = smov 0  }
   0x6   :  { %s1302_s26 = smov 0   ;;  %s1304_s27 = smov 0  }
   0x7 LB: > { %s1319_s28 = sadd.s32 4294967295, %s1245_s27   ;;  %s812_s29 = sadd.s32 4294967294, %s1245_s27   ;;  %s1245_s27 = sphi %s1304_s27, %s1642_s27   ;;  %s1241_s26 = sphi %s1302_s26, %s1641_s26   ;;  %s1237_s25 = sphi %s1300_s25, %s1640_s25   ;;  %s1233_s24 = sphi %s1298_s24, %s1639_s24  }
   0x8   : > { %p45_p0 = scmp.ne.s32.totalorder %s1237_s25, %s1233_s24  ;;  %p1618_p1 = scmp.eq.s32.totalorder %s1319_s28, 0 }
   0x9   : > { %p201_p3 = scmp.eq.s32.totalorder %s812_s29, 3  ;;  %p813_p5 = scmp.ge.s32.totalorder %s1245_s27, 1 }
   0xa   : > { %p1328_p4 = por %p1618_p1, %p45_p0  ;;  %p208_p7 = scmp.lt.s32.totalorder %s1245_s27, 5 }
   0xb   : > { %p1333_p6 = por %p201_p3, %p45_p0  ;;  %s1247_s10 = smov [#allocation5]  }
   0xc   : > { %s1622_s30 = scalar_select %p1328_p4, 1, 0 }
   0xd   : > { %s1623_s8 = scalar_select %p1333_p6, 1, 0 }
   0xe   : > { %p1338_p8 = pnand %p813_p5, %p208_p7  ;;  %s220_s11 = sshll.u32 %s1247_s10, 4  ;;  %s1342_s11 = int_to_ptr.vmem [resolvable:$true] %s220_s11 }
   0xf   : > { %1624 = sst [smem:[#allocation15_spill]] %s1623_s8  ;;  %s1248_s13 = smov [#allocation7]  }
  0x10   : > { %s1625_s9 = scalar_select %p1338_p8, 1, 0 }
  0x11   : > { %p965_p9 = pneg %p1338_p8  ;;  %s236_s14 = sshll.u32 %s1248_s13, 4  ;;  %s1352_s14 = int_to_ptr.vmem [resolvable:$true] %s236_s14 }
  0x12   : > { %s1249_s15 = smov [#allocation8]   ;;  %s1057_s19 = scalar_lea.hbm %s1611_s1, 1024 }
  0x13   : > { %p1348_p10 = pnand %p965_p9, %p1618_p1  ;;  %s1354_s16 = sshll.u32 %s1249_s15, 4  ;;  %s253_s16 = int_to_ptr.vmem [resolvable:$true] %s1354_s16 }
  0x14   : > { %p1058_p11 = scmp.ne.s32.totalorder %s1611_s1, %s1057_s19  ;;  %p1064_p3 = scmp.lt.u32.totalorder %s1057_s19, %s1611_s1 }
  0x15   : > { %p1364_p12 = pneg %p1348_p10 }
  0x17   : > { %p1060_p13 = pnand %p1364_p12, %p1058_p11 }
  0x19   : > { %p1061_p0 = pneg %p1060_p13 }
  0x1b   : > { %p1066_p5 = pnand %p1064_p3, %p1061_p0 }
  0x1d   : > { %1069 = shalt.err (!%p1066_p5)
}
  0x1e   : > { %s1070_s10 = scalar_lea.vmem %s1342_s11, 1024  ;;  %p1078_p2 = scmp.lt.s32.totalorder %s1342_s11, %s1342_s11 }
  0x1f   : > { %p1071_p7 = scmp.ne.s32.totalorder %s1342_s11, %s1070_s10  ;;  %p1079_p6 = scmp.lt.s32.totalorder %s1070_s10, %s1070_s10 }
  0x21   : > { %p1073_p9 = pnand %p1071_p7, %p1364_p12  ;;  %p1080_p11 = por %p1079_p6, %p1078_p2 }
  0x23   : > { %p1074_p1 = pneg %p1073_p9 }
  0x25   : > { %p1081_p13 = pnand %p1080_p11, %p1074_p1 }
  0x27   : > { %1084 = shalt.err (!%p1081_p13)
}
  0x28   : > { %s1250_s13 = smov 64   ;;  %s1251_s15 = smov 4  }
  0x29   : > { %968 = dma.hbm_to_vmem [thread:$0]  (!%p1348_p10), %s1611_s1, 1024, %s1342_s11, [#allocation6], %s1250_s13, %s1250_s13, %s1251_s15  }
  0x2a   : > { %s1085_s21 = scalar_lea.hbm %s1613_s3, 1024 }
  0x2b   : > { %p1086_p1 = scmp.ne.s32.totalorder %s1613_s3, %s1085_s21  ;;  %p1092_p0 = scmp.lt.u32.totalorder %s1085_s21, %s1613_s3 }
  0x2d   : > { %p1088_p2 = pnand %p1086_p1, %p1364_p12 }
  0x2f   : > { %p1089_p6 = pneg %p1088_p2 }
  0x31   : > { %p1094_p3 = pnand %p1092_p0, %p1089_p6 }
  0x33   : > { %1097 = shalt.err (!%p1094_p3)
}
  0x34   : > { %s1098_s11 = scalar_lea.vmem %s1352_s14, 1024  ;;  %p1106_p11 = scmp.lt.s32.totalorder %s1352_s14, %s1352_s14 }
  0x35   : > { %p1099_p5 = scmp.ne.s32.totalorder %s1352_s14, %s1098_s11  ;;  %p1107_p13 = scmp.lt.s32.totalorder %s1098_s11, %s1098_s11 }
  0x37   : > { %p1101_p7 = pnand %p1099_p5, %p1364_p12  ;;  %p1108_p1 = por %p1107_p13, %p1106_p11 }
  0x39   : > { %p1102_p9 = pneg %p1101_p7 }
  0x3b   : > { %p1109_p2 = pnand %p1108_p1, %p1102_p9 }
  0x3d   : > { %1112 = shalt.err (!%p1109_p2)
}
  0x3e   : > { %971 = dma.hbm_to_vmem [thread:$0]  (!%p1348_p10), %s1613_s3, 1024, %s1352_s14, [#allocation6], %s1250_s13, %s1250_s13, %s1251_s15  }
  0x3f   : > { %s1113_s20 = scalar_lea.hbm %s1615_s5, 1024 }
  0x40   : > { %p1114_p6 = scmp.ne.s32.totalorder %s1615_s5, %s1113_s20  ;;  %p1120_p5 = scmp.lt.u32.totalorder %s1113_s20, %s1615_s5 }
  0x42   : > { %p1116_p0 = pnand %p1114_p6, %p1364_p12 }
  0x44   : > { %p1117_p3 = pneg %p1116_p0 }
  0x46   : > { %p1122_p7 = pnand %p1120_p5, %p1117_p3 }
  0x48   : > { %1125 = shalt.err (!%p1122_p7)
}
  0x49   : > { %s1126_s11 = scalar_lea.vmem %s253_s16, 1024  ;;  %p1134_p1 = scmp.lt.s32.totalorder %s253_s16, %s253_s16 }
  0x4a   : > { %p1127_p9 = scmp.ne.s32.totalorder %s253_s16, %s1126_s11  ;;  %p1135_p2 = scmp.lt.s32.totalorder %s1126_s11, %s1126_s11 }
  0x4c   : > { %p1129_p11 = pnand %p1127_p9, %p1364_p12  ;;  %p1136_p4 = por %p1135_p2, %p1134_p1 }
  0x4e   : > { %p1130_p13 = pneg %p1129_p11 }
  0x50   : > { %p1137_p8 = pnand %p1136_p4, %p1130_p13 }
  0x52   : > { %1140 = shalt.err (!%p1137_p8)
}
  0x53   : > { %974 = dma.hbm_to_vmem [thread:$0]  (!%p1348_p10), %s1615_s5, 1024, %s253_s16, [#allocation9], %s1250_s13, %s1250_s13, %s1251_s15  }
  0x54   : > { %s1437_s22 = sadd.s32 1, %s1245_s27   ;;  %s32_s17 = sadd.s32 1, %s1241_s26 }
  0x55   : > { %s29_s12 = ssub.s32 %s1245_s27, %s1437_s22  ;;  %p39_p8 = scmp.ne.s32.totalorder %s1241_s26, %s1237_s25 }
  0x56   : > { %p30_p4 = scmp.eq.s32.totalorder %s29_s12, 0  ;;  %p40_p12 = scmp.eq.s32.totalorder %s1245_s27, 0 }
  0x57   : > { %p986_p6 = scmp.lt.s32.totalorder %s1245_s27, 4  ;;  %p1628_p3 = scmp.eq.s32.totalorder %s1319_s28, 3 }
  0x58   : > { %s1447_s18 = scalar_select %p30_p4, %s1241_s26, %s32_s17  }
  0x59   : > { %p41_p0 = por %p40_p12, %p39_p8  ;;  %p1451_p5 = por %p1628_p3, %p39_p8 }
  0x5a   : > { %s269_s20 = sand.u32 1, %s1241_s26   ;;  %s860_s21 = sshll.u32 %s1245_s27, 7 }
  0x5b   : > { %s818_s16 = sshll.u32 %s269_s20, 3  ;;  %s1460_s10 = scalar_lea.hbm %s1610_s0, %s860_s21 }
  0x5c   : > { %s273_s11 = scalar_lea.vmem [#allocation2], %s818_s16  ;;  %p1462_p10 = pnand %p986_p6, %p41_p0 }
  0x5d   : > { %s280_s14 = sshll.u32 %s273_s11, 4  ;;  %s1468_s12 = scalar_lea.sflag [#allocation3], %s269_s20  ;;  %s1466_s14 = int_to_ptr.vmem [resolvable:$true] %s280_s14 }
  0x5e   : > { %s1141_s17 = scalar_lea.hbm %s1460_s10, 128  ;;  %p1143_p9 = pneg %p1462_p10 }
  0x5f   : > { %p1142_p7 = scmp.ne.s32.totalorder %s1460_s10, %s1141_s17  ;;  %s1146_s23 = scalar_lea.hbm %s1610_s0, 512 }
  0x60   : > { %p1147_p1 = scmp.lt.u32.totalorder %s1460_s10, %s1610_s0  ;;  %p1148_p2 = scmp.lt.u32.totalorder %s1146_s23, %s1141_s17 }
  0x61   : > { %p1144_p11 = pnand %p1143_p9, %p1142_p7  ;;  %p1150_p8 = scmp.lt.u32.totalorder %s1141_s17, %s1460_s10 }
  0x62   : > { %p1149_p4 = por %p1148_p2, %p1147_p1 }
  0x63   : > { %p1145_p13 = pneg %p1144_p11 }
  0x64   : > { %p1151_p12 = por %p1150_p8, %p1149_p4 }
  0x66   : > { %p1152_p6 = pnand %p1151_p12, %p1145_p13 }
  0x68   : > { %1155 = shalt.err (!%p1152_p6)
}
  0x69   : > { %s1156_s20 = scalar_lea.vmem %s1466_s14, 128  ;;  %s1252_s21 = smov [#allocation2]  }
  0x6a   : > { %p1157_p0 = scmp.ne.s32.totalorder %s1466_s14, %s1156_s20  ;;  %s1161_s16 = sshll.u32 %s1252_s21, 4  ;;  %s1162_s16 = int_to_ptr.vmem [resolvable:$false] %s1161_s16 }
  0x6b   : > { %s1163_s29 = scalar_lea.vmem %s1162_s16, 256  ;;  %p1164_p11 = scmp.lt.s32.totalorder %s1466_s14, %s1162_s16 }
  0x6c   : > { %p1159_p3 = pnand %p1157_p0, %p1143_p9  ;;  %p1165_p1 = scmp.lt.s32.totalorder %s1163_s29, %s1156_s20 }
  0x6e   : > { %p1160_p7 = pneg %p1159_p3  ;;  %p1166_p2 = por %p1165_p1, %p1164_p11 }
  0x70   : > { %p1167_p4 = pnand %p1166_p2, %p1160_p7 }
  0x72   : > { %1170 = shalt.err (!%p1167_p4)
}
  0x73   : > { %978 = dma.hbm_to_vmem [thread:$0]  (!%p1462_p10), %s1460_s10, 128, %s1466_s14, %s1468_s12, %s1250_s13, %s1250_s13, %s1251_s15  }
  0x74   : > { %p1631_p9 = scmp.ne.s32.totalorder %s1625_s9, 0 }
  0x75   : > { %s1502_s17 = sand.u32 (!%p1631_p9), 1, %s1237_s25   ;;  %p1632_p13 = scmp.ne.s32.totalorder (!%p1631_p9), %s1622_s30, 0 }
  0x76   : > { %292 = sbr.rel (%p1631_p9) target bundleno = 838 (0x346), region = 48  ;;  %s822_s23 = sshll.u32 (!%p1631_p9), %s1502_s17, 3 }
  0x77   : > { %s295_s11 = scalar_lea.sflag (!%p1631_p9), [#allocation3], %s1502_s17  ;;  %s1506_s20 = scalar_lea.vmem (!%p1631_p9), [#allocation2], %s822_s23 }
  0x7d   : > { %1216 = dma.done.wait (%p1632_p13), %s295_s11, 128  }
  0x7e   : > { %1218 = vsyncadd (%p1632_p13), %s295_s11, 4294967168  ;;  %p1633_p10 = scmp.eq.s32.totalorder %s1319_s28, 0 }
  0x80   : > { %1220 = dma.done.wait (%p1633_p10), [#allocation6], 2048   ;;  %p1634_p8 = pmov %p1633_p10 }
  0x82   : > { %1222 = vsyncadd (%p1634_p8), [#allocation6], 4294965248  ;;  %p1635_p12 = pmov %p1634_p8 }
  0x83   : > { %p1636_p6 = pmov %p1634_p8 }
  0x84   : > { %1224 = dma.done.wait (%p1635_p12), [#allocation9], 1024  }
  0x85   : > { %1226 = vsyncadd (%p1636_p6), [#allocation9], 4294966272  ;;  %v1253_v0 = vmov 0.0   ;;  %vm1254_vm0 = vmmov 0   ;;  %v1032_v1 = vld [vmem:[#allocation5] sm:$0xff]   ;;  %v1033_v2 = vld [vmem:[#allocation5 + $0x8] sm:$0xff]  }
  0x86   : > { %889 = vmatprep.subr.bf16.mxu0 %v1253_v0  ;;  %905 = vmatprep.mubr.msk.bf16.mxu0 %vm1254_vm0, %v1253_v0  ;;  %v1034_v3 = vld [vmem:[#allocation5 + $0x10] sm:$0xff]   ;;  %v1041_v4 = vld [vmem:[#allocation7] sm:$0xff]   ;;  %v1035_v5 = vld [vmem:[#allocation5 + $0x18] sm:$0xff]   ;;  %s826_s10 = sshll.u32 %s1502_s17, 4  ;;  %s861_s16 = sshll.u32 %s1319_s28, 8 }
  0x87   : > { %909 = vmatprep.subr.bf16.mxu1 %v1253_v0  ;;  %925 = vmatprep.mubr.msk.bf16.mxu1 %vm1254_vm0, %v1253_v0  ;;  %v1042_v6 = vld [vmem:[#allocation7 + $0x8] sm:$0xff]   ;;  %v1036_v7 = vld [vmem:[#allocation5 + $0x20] sm:$0xff]   ;;  %v1043_v8 = vld [vmem:[#allocation7 + $0x10] sm:$0xff]   ;;  %s340_s12 = scalar_lea.vmem [#allocation10], %s826_s10  ;;  %s1567_s11 = scalar_lea.hbm %s1617_s7, %s861_s16 }
  0x88   : > { %890 = vmatpush3.bf16.msra.mxu0 %v1032_v1  ;;  %910 = vmatpush3.bf16.msra.mxu1 %v1041_v4  ;;  %v1037_v9 = vld [vmem:[#allocation5 + $0x28] sm:$0xff]   ;;  %v1044_v10 = vld [vmem:[#allocation7 + $0x18] sm:$0xff]   ;;  %v1038_v11 = vld [vmem:[#allocation5 + $0x30] sm:$0xff]   ;;  %s710_s21 = sshll.u32 %s340_s12, 4  ;;  %s1255_s30 = smov [#allocation10]   ;;  %s1562_s21 = int_to_ptr.vmem [resolvable:$true] %s710_s21 }
  0x89   : > { %891 = vmatprep.subr.bf16.mxu0 %v1253_v0  ;;  %911 = vmatprep.subr.bf16.mxu1 %v1253_v0  ;;  %v1045_v12 = vld [vmem:[#allocation7 + $0x20] sm:$0xff]   ;;  %v1039_v13 = vld [vmem:[#allocation5 + $0x38] sm:$0xff]   ;;  %v1046_v14 = vld [vmem:[#allocation7 + $0x28] sm:$0xff]   ;;  %s1171_s28 = scalar_lea.vmem %s1562_s21, 256  ;;  %s1175_s9 = sshll.u32 %s1255_s30, 4  ;;  %s1176_s9 = int_to_ptr.vmem [resolvable:$false] %s1175_s9 }
  0x8a   : > { %v1040_v15 = vld [vmem:[%s1506_s20] sm:$0xff]   ;;  %v1049_v18 = vld [vmem:[#allocation8] sm:$0xff]   ;;  %v1050_v19 = vld [vmem:[#allocation8 + $0x8] sm:$0xff]   ;;  %s697_s20 = scalar_lea.sflag [#allocation4], %s1502_s17  ;;  %p1172_p0 = scmp.ne.s32.totalorder %s1562_s21, %s1171_s28 }
  0x8b   : > { %v1047_v16 = vld [vmem:[#allocation7 + $0x30] sm:$0xff]   ;;  %v1048_v17 = vld [vmem:[#allocation7 + $0x38] sm:$0xff]   ;;  %v1053_v22 = vld [vmem:[#allocation8 + $0x20] sm:$0xff]   ;;  %s1177_s13 = scalar_lea.vmem %s1176_s9, 512  ;;  %p1178_p11 = scmp.lt.s32.totalorder %s1562_s21, %s1176_s9 }
  0x8c   : > { %892 = vmatpush3.bf16.msra.mxu0 %v1033_v2  ;;  %912 = vmatpush3.bf16.msra.mxu1 %v1042_v6  ;;  %v1051_v20 = vld [vmem:[#allocation8 + $0x10] sm:$0xff]   ;;  %v1052_v21 = vld [vmem:[#allocation8 + $0x18] sm:$0xff]   ;;  %v1054_v23 = vld [vmem:[#allocation8 + $0x28] sm:$0xff]   ;;  %p1173_p3 = pnand %p1172_p0, %p1451_p5  ;;  %p1179_p1 = scmp.lt.s32.totalorder %s1177_s13, %s1171_s28 }
  0x8d   : > { %893 = vmatprep.subr.bf16.mxu0 %v1253_v0  ;;  %913 = vmatprep.subr.bf16.mxu1 %v1253_v0  ;;  %v827_v24 = vld [vmem:[%s1612_s2] ss:$0 sm:$0xff]  ;;  %v1056_v35 = vld [vmem:[#allocation8 + $0x38] sm:$0xff]  }
  0x8e   : > { %v1055_v34 = vld [vmem:[#allocation8 + $0x30] sm:$0xff]   ;;  %p1174_p7 = pneg %p1173_p3  ;;  %p1180_p2 = por %p1179_p1, %p1178_p11 }
  0x8f   : > { %v837_v36 = vld [vmem:[%s1614_s4] ss:$0 sm:$0xff] }
  0x90   : > { %894 = vmatpush3.bf16.msra.mxu0 %v1034_v3  ;;  %914 = vmatpush3.bf16.msra.mxu1 %v1043_v8  ;;  %v846_v46 = vld [vmem:[%s1616_s6] ss:$0 sm:$0xff]  ;;  %p1181_p4 = pnand %p1180_p2, %p1174_p7 }
  0x91   : > { %895 = vmatprep.subr.bf16.mxu0 %v1253_v0  ;;  %915 = vmatprep.subr.bf16.mxu1 %v1253_v0 }
  0x94   : > { %896 = vmatpush3.bf16.msra.mxu0 %v1035_v5  ;;  %916 = vmatpush3.bf16.msra.mxu1 %v1044_v10 }
  0x95   : > { %897 = vmatprep.subr.bf16.mxu0 %v1253_v0  ;;  %917 = vmatprep.subr.bf16.mxu1 %v1253_v0 }
  0x98   : > { %898 = vmatpush3.bf16.msra.mxu0 %v1036_v7  ;;  %918 = vmatpush3.bf16.msra.mxu1 %v1045_v12 }
  0x99   : > { %899 = vmatprep.subr.bf16.mxu0 %v1253_v0  ;;  %919 = vmatprep.subr.bf16.mxu1 %v1253_v0 }
  0x9c   : > { %900 = vmatpush3.bf16.msra.mxu0 %v1037_v9  ;;  %920 = vmatpush3.bf16.msra.mxu1 %v1046_v14 }
  0x9d   : > { %901 = vmatprep.subr.bf16.mxu0 %v1253_v0  ;;  %921 = vmatprep.subr.bf16.mxu1 %v1253_v0 }
  0xa0   : > { %902 = vmatpush3.bf16.msra.mxu0 %v1038_v11  ;;  %922 = vmatpush3.bf16.msra.mxu1 %v1047_v16 }
  0xa1   : > { %903 = vmatprep.subr.bf16.mxu0 %v1253_v0  ;;  %923 = vmatprep.subr.bf16.mxu1 %v1253_v0 }
  0xa4   : > { %904 = vmatpush3.bf16.msra.mxu0 %v1039_v13  ;;  %924 = vmatpush3.bf16.msra.mxu1 %v1048_v17 }
  0xa5   : > { %929 = vmatprep.subr.bf16.mxu0 %v1253_v0 }
  0xa7   : > { %906 = vmatmul.mubr.bf16.vlgmr.msra.gmra.mrb[0].mxu0 %v1040_v15 }
  0xa8   : > { %945 = vmatprep.mubr.msk.bf16.mxu0 %vm1254_vm0, %v1253_v0  ;;  %930 = vmatpush3.bf16.msra.mxu0 %v1049_v18 }
  0xa9   : > { %931 = vmatprep.subr.bf16.mxu0 %v1253_v0 }
  0xac   : > { %932 = vmatpush3.bf16.msra.mxu0 %v1050_v19 }
  0xad   : > { %933 = vmatprep.subr.bf16.mxu0 %v1253_v0 }
  0xb0   : > { %934 = vmatpush3.bf16.msra.mxu0 %v1051_v20 }
  0xb1   : > { %935 = vmatprep.subr.bf16.mxu0 %v1253_v0 }
  0xb4   : > { %936 = vmatpush3.bf16.msra.mxu0 %v1052_v21 }
  0xb5   : > { %937 = vmatprep.subr.bf16.mxu0 %v1253_v0 }
  0xb8   : > { %938 = vmatpush3.bf16.msra.mxu0 %v1053_v22 }
  0xb9   : > { %939 = vmatprep.subr.bf16.mxu0 %v1253_v0 }
  0xbc   : > { %940 = vmatpush3.bf16.msra.mxu0 %v1054_v23 }
  0xbd   : > { %941 = vmatprep.subr.bf16.mxu0 %v1253_v0 }
  0xc0   : > { %942 = vmatpush3.bf16.msra.mxu0 %v1055_v34 }
  0xc1   : > { %943 = vmatprep.subr.bf16.mxu0 %v1253_v0 }
  0xc4   : > { %944 = vmatpush3.bf16.msra.mxu0 %v1056_v35 }
 0x17a   : > { %v457_v25 = vpop.f32.mrb[0].mxu0 }
 0x17b   : > { %v458_v26 = vadd.f32 %v827_v24, %v457_v25  ;;  %v907_v27 = vpop.f32.mrb[1].mxu0 }
 0x17c   : > { %v460_v28 = vpop.f32.mrb[2].mxu0 }
 0x17d   : > { %v461_v29 = vadd.f32 %v827_v24, %v460_v28  ;;  %v908_v30 = vpop.f32.mrb[3].mxu0  ;;  %v464_v31 = vmax.f32 %v458_v26, 0.0 }
 0x17f   : > { %v465_v32 = vmax.f32 %v461_v29, 0.0 }
 0x181   : > { %v466_v33 = vpack.c.bf16 %v465_v32, %v464_v31 }
 0x183   : > { %926 = vmatmul.mubr.bf16.vlgmr.msra.gmra.mrb[0].mxu1 %v466_v33 }
 0x256   : > { %v572_v37 = vpop.f32.mrb[0].mxu1 }
 0x257   : > { %v573_v38 = vadd.f32 %v837_v36, %v572_v37  ;;  %v927_v39 = vpop.f32.mrb[1].mxu1 }
 0x258   : > { %v575_v40 = vpop.f32.mrb[2].mxu1 }
 0x259   : > { %v576_v41 = vadd.f32 %v837_v36, %v575_v40  ;;  %v928_v42 = vpop.f32.mrb[3].mxu1  ;;  %v579_v43 = vmax.f32 %v573_v38, 0.0 }
 0x25b   : > { %v580_v44 = vmax.f32 %v576_v41, 0.0 }
 0x25d   : > { %v581_v45 = vpack.c.bf16 %v580_v44, %v579_v43 }
 0x25f   : > { %946 = vmatmul.mubr.bf16.vlgmr.msra.gmra.mrb[4].mxu0 %v581_v45 }
 0x332   : > { %v687_v47 = vpop.f32.mrb[4].mxu0 }
 0x333   : > { %v688_v48 = vadd.f32 %v846_v46, %v687_v47  ;;  %v947_v49 = vpop.f32.mrb[5].mxu0 }
 0x334   : > { %v690_v50 = vpop.f32.mrb[6].mxu0 }
 0x335   : > { %694 = vst [vmem:[%s340_s12] sm:$0xff] %v688_v48  ;;  %v691_v51 = vadd.f32 %v846_v46, %v690_v50  ;;  %v948_v52 = vpop.f32.mrb[7].mxu0 }
 0x337   : > { %695 = vst [vmem:[%s340_s12 + $0x8] sm:$0xff] %v691_v51 }
 0x338   : > { %1184 = shalt.err (!%p1181_p4)
}
 0x339   : > { %s1185_s15 = scalar_lea.hbm %s1567_s11, 256  ;;  %s1189_s8 = scalar_lea.hbm %s1617_s7, 1024 }
 0x33a   : > { %p1186_p9 = scmp.ne.s32.totalorder %s1567_s11, %s1185_s15  ;;  %p1190_p8 = scmp.lt.u32.totalorder %s1567_s11, %s1617_s7 }
 0x33b   : > { %p1191_p12 = scmp.lt.u32.totalorder %s1189_s8, %s1185_s15  ;;  %p1193_p0 = scmp.lt.u32.totalorder %s1185_s15, %s1567_s11 }
 0x33c   : > { %p1187_p13 = pnand %p1186_p9, %p1451_p5 }
 0x33d   : > { %p1192_p6 = por %p1191_p12, %p1190_p8 }
 0x33e   : > { %p1188_p10 = pneg %p1187_p13 }
 0x33f   : > { %p1194_p3 = por %p1193_p0, %p1192_p6 }
 0x341   : > { %p1195_p7 = pnand %p1194_p3, %p1188_p10 }
 0x343   : > { %1198 = shalt.err (!%p1195_p7)
}
 0x344   : > { %s1256_s29 = smov 128   ;;  %s1257_s23 = smov 8  }
 0x345   : > { %963 = dma.vmem_to_hbm [thread:$0]  (%p1451_p5), %s1562_s21, 256, %s1567_s11, %s697_s20, %s1256_s29, %s1256_s29, %s1257_s23  }
 0x346 PF: > { %s1637_s28 = sld [smem:[#allocation15_spill]]  ;;  %p990_p11 = scmp.ge.s32.totalorder %s1245_s27, 2 }
 0x347   : > { %s725_s30 = sand.u32 1, %s1233_s24  }
 0x348   : > { %s726_s9 = scalar_lea.sflag [#allocation4], %s725_s30 }
 0x34c   : > { %p1638_p1 = scmp.ne.s32.totalorder %s1637_s28, 0 }
 0x34e   : > { %p980_p2 = pnand %p990_p11, %p1638_p1 }
 0x350   : > { %1228 = dma.done.wait (!%p980_p2), %s726_s9, 256  }
 0x351   : > { %1230 = vsyncadd (!%p980_p2), %s726_s9, 4294967040  ;;  %p22_p4 = scmp.ge.s32.totalorder %s1437_s22, 6   ;;  %s1639_s24 = smov %s1237_s25 }
 0x352   : > { %s1640_s25 = smov %s1241_s26  ;;  %s1641_s26 = smov %s1447_s18 }
 0x353   : > { %s1642_s27 = smov %s1437_s22  ;;  %24 = sbr.rel (!%p22_p4) target bundleno = 7 (0x7), region = 105 }
 0x35a   :  { %731 = vsyncpa [#allocation3], 1 }
 0x35b   :  { %733 = vsyncpa [#allocation3 + $0x1], 1 }
 0x35c   :  { %734 = vsyncpa [#allocation6], 1 }
 0x35d   :  { %735 = vsyncpa [#allocation9], 1 }
 0x35e   :  { %736 = vsyncpa [#allocation4], 1 }
 0x35f   :  { %738 = vsyncpa [#allocation4 + $0x1], 1 }

</bundles_post_ra>
